<compile_context>
chip_gen: v6e
topology: v6e:2x2x1
jax: 0.10.0
libtpu: 0.0.40
codegen_flags: <defaults>
</compile_context>

<pallas_src>
import functools

import jax
import jax.numpy as jnp
from jax.experimental import pallas as pl
from jax.experimental.pallas import tpu as pltpu

_C_PAD = 128  # lane-dense classifier width (true num_labels sliced in wrapper)


def _round_up(n, m):
    return ((n + m - 1) // m) * m


def _model_kernel(ids_ref, emb_ref, w_ref, b_ref, prob_ref, *,
                  seq_chunk, vocab_pad):
    blk, S = ids_ref.shape
    n_chunks = S // seq_chunk

    # Hoisted one-hot iota (JAX does not CSE broadcast_in_dim inside loops).
    oh_iota = jax.lax.broadcasted_iota(
        jnp.int32, (blk, seq_chunk, vocab_pad), 2)

    def chunk_counts(start):
        # Token histogram of one sequence slab: [BLK, V] f32.
        ids_c = ids_ref[:, pl.ds(start, seq_chunk)]              # [BLK, chunk] i32
        oh = (ids_c[:, :, None] == oh_iota).astype(jnp.float32)  # [BLK, chunk, V]
        return jnp.sum(oh, axis=1)                               # sublane reduce

    if n_chunks == 1:
        counts_raw = chunk_counts(0)
    else:
        counts_raw = jax.lax.fori_loop(
            0, n_chunks,
            lambda c, acc: acc + chunk_counts(
                pl.multiple_of(c * seq_chunk, seq_chunk)),
            jnp.zeros((blk, vocab_pad), jnp.float32))

    # mask = (ids != 1): drop the pad-token column; denom = #non-pad tokens.
    col = jax.lax.broadcasted_iota(jnp.int32, (1, vocab_pad), 1)
    counts = counts_raw * (col != 1).astype(jnp.float32)             # [BLK, V]
    denom = jnp.maximum(jnp.float32(S) - counts_raw[:, 1:2], 1.0)    # [BLK, 1]

    # Masked-sum of embeddings == counts @ table (bf16 MXU, f32 accumulate).
    # counts are exact small integers (<= S), so bf16 is lossless for S <= 256.
    pooled = jnp.dot(counts.astype(jnp.bfloat16), emb_ref[...],
                     preferred_element_type=jnp.float32) / denom     # [BLK, H]

    # Classifier head (f32; trivially small) + sigmoid, lane-dense store.
    logits = jnp.dot(pooled, w_ref[...],
                     preferred_element_type=jnp.float32) + b_ref[...]
    prob_ref[...] = jax.nn.sigmoid(logits)                           # [BLK, 128]


def _vmem_limit_bytes():
    try:
        phys = int(pltpu.get_tpu_info().vmem_capacity_bytes)
    except Exception:
        phys = 64 << 20            # conservative (v7x physical per-TC)
    return int(min(max(32 << 20, phys // 2), 100 << 20))


def _pick_block_b(B, S, H, vocab_pad, seq_chunk, vmem_limit):
    resident = vocab_pad * H * 2 + H * _C_PAD * 4 + _C_PAD * 4
    per_row = (2 * S * 4                        # ids, double-buffered
               + 2 * _C_PAD * 4                 # prob out, double-buffered
               + vocab_pad * 4                  # counts accumulator
               + 2 * seq_chunk * vocab_pad * 4  # one-hot slab (+ iota)
               + (H + _C_PAD) * 8)              # pooled / logits temporaries
    budget = int(vmem_limit * 0.6) - resident
    bb = max(8, budget // max(per_row, 1))
    bb = max(8, min((bb // 8) * 8, 1024))
    return bb


def gnn_regvd_forward(input_ids, labels, emb_table, w, b, *, block_b=None):
    """Returns (loss, prob) like Model.forward(input_ids, labels)."""
    B, S = input_ids.shape
    V, H = emb_table.shape
    C = w.shape[1]
    vocab_pad = _round_up(max(V, 1), 128)

    # Sequence slab size for the chunked in-kernel pooling reduce.
    if S <= 256:
        seq_chunk = S
    else:
        seq_chunk = S
        for cand in (256, 128, 64, 32, 16, 8):
            if S % cand == 0:
                seq_chunk = cand
                break

    vmem_limit = _vmem_limit_bytes()
    if block_b is None:
        block_b = _pick_block_b(B, S, H, vocab_pad, seq_chunk, vmem_limit)
    block_b = max(8, (block_b // 8) * 8)
    block_b = min(block_b, _round_up(B, 8))
    B_pad = _round_up(B, block_b)

    # Padded operands: batch rows padded with the pad-token id 1 (so they pool
    # to zero and are sliced away); vocab rows and classifier lanes zero-padded
    # so the MXU contractions and the prob store are lane-dense.
    ids_pad = jnp.full((B_pad, S), 1, dtype=jnp.int32).at[:B].set(
        input_ids.astype(jnp.int32))
    emb_pad = jnp.zeros((vocab_pad, H), jnp.bfloat16).at[:V].set(
        emb_table.astype(jnp.bfloat16))
    w_pad = jnp.zeros((H, _C_PAD), jnp.float32).at[:, :C].set(
        w.astype(jnp.float32))
    b_pad = jnp.zeros((1, _C_PAD), jnp.float32).at[:, :C].set(
        jnp.reshape(b, (1, C)).astype(jnp.float32))

    kernel = functools.partial(_model_kernel, seq_chunk=seq_chunk,
                               vocab_pad=vocab_pad)

    prob_pad = pl.pallas_call(
        kernel,
        grid=(B_pad // block_b,),
        in_specs=[
            pl.BlockSpec((block_b, S), lambda i: (i, 0)),        # ids (int32)
            pl.BlockSpec((vocab_pad, H), lambda i: (0, 0)),      # emb (resident)
            pl.BlockSpec((H, _C_PAD), lambda i: (0, 0)),         # W   (resident)
            pl.BlockSpec((1, _C_PAD), lambda i: (0, 0)),         # bias
        ],
        out_specs=pl.BlockSpec((block_b, _C_PAD), lambda i: (i, 0)),
        out_shape=jax.ShapeDtypeStruct((B_pad, _C_PAD), jnp.float32),
        compiler_params=pltpu.CompilerParams(
            dimension_semantics=("parallel",),   # v7x: shard batch over 2 TCs
            vmem_limit_bytes=vmem_limit),
    )(ids_pad, emb_pad, w_pad, b_pad)

    prob = prob_pad[:B, :C]

    # Model.forward loss over the TRUE batch (B scalar ops -- not worth an
    # extra HBM output stream from the kernel).
    y = labels.astype(jnp.float32)
    p0 = prob[:, 0]
    loss = -jnp.mean(jnp.log(p0 + 1e-10) * y
                     + jnp.log(1.0 - p0 + 1e-10) * (1.0 - y))
    return loss, prob


def _reference(input_ids, labels, emb_table, w, b):
    x = jnp.take(emb_table, input_ids, axis=0).astype(jnp.float32)
    m = (input_ids != 1).astype(jnp.float32)
    pooled = jnp.sum(x * m[:, :, None], axis=1) / jnp.maximum(
        jnp.sum(m, axis=1, keepdims=True), 1.0)
    logits = pooled @ w.astype(jnp.float32) + b.astype(jnp.float32)
    prob = jax.nn.sigmoid(logits)
    y = labels.astype(jnp.float32)
    loss = -(jnp.log(prob[:, 0] + 1e-10) * y
             + jnp.log(1.0 - prob[:, 0] + 1e-10) * (1.0 - y)).mean()
    return loss, prob


if __name__ == "__main__":
    B, S, H, C, VOCAB = 4, 8, 32, 2, 50

    key = jax.random.PRNGKey(0)
    k_ids, k_lab, k_emb, k_w = jax.random.split(key, 4)

    input_ids = jax.random.randint(k_ids, (B, S), 0, VOCAB, dtype=jnp.int32)
    labels = jax.random.randint(k_lab, (B,), 0, 2, dtype=jnp.int32)

    # Deterministic synthetic parameters (encoder embedding + classifier head).
    emb_table = (0.02 * jax.random.normal(k_emb, (VOCAB, H))).astype(jnp.bfloat16)
    w = (0.02 * jax.random.normal(k_w, (H, C))).astype(jnp.float32)
    b = jnp.zeros((1, C), dtype=jnp.float32)

    loss, prob = gnn_regvd_forward(input_ids, labels, emb_table, w, b)
    jax.block_until_ready((loss, prob))

    ref_loss, ref_prob = _reference(input_ids, labels, emb_table, w, b)
    assert prob.shape == (B, C), "prob shape mismatch"
    assert jnp.allclose(prob, ref_prob, atol=1e-5), "prob mismatch"
    assert jnp.allclose(loss, ref_loss, atol=1e-5), "loss mismatch"

    print("KERNEL_OK")
</pallas_src>

<mosaic_0001>
module attributes {stable_mosaic.version = 11 : i64} {
  func.func @_model_kernel(%arg0: i32, %arg1: memref<8x8xi32, #tpu.memory_space<vmem>>, %arg2: memref<128x32xbf16, #tpu.memory_space<vmem>>, %arg3: memref<32x128xf32, #tpu.memory_space<vmem>>, %arg4: memref<1x128xf32, #tpu.memory_space<vmem>>, %arg5: memref<8x128xf32, #tpu.memory_space<vmem>>) attributes {dimension_semantics = [#tpu.dimension_semantics<parallel>], iteration_bounds = array<i64: 1>, scalar_prefetch = 0 : i64, scratch_operands = 0 : i64, tpu.core_type = #tpu.core_type<tc>, window_params = [{transform_indices = @transform_0, window_bounds = array<i64: 8, 8>}, {pipeline_mode = #tpu.pipeline_mode<synchronous>, transform_indices = @transform_1, window_bounds = array<i64: 128, 32>}, {pipeline_mode = #tpu.pipeline_mode<synchronous>, transform_indices = @transform_2, window_bounds = array<i64: 32, 128>}, {pipeline_mode = #tpu.pipeline_mode<synchronous>, transform_indices = @transform_3, window_bounds = array<i64: 1, 128>}, {transform_indices = @transform_4, window_bounds = array<i64: 8, 128>}]} {
    %0 = tpu.iota {dimensions = array<i32: 2>} : vector<8x8x128xi32>
    %c0 = arith.constant 0 : index
    %c0_0 = arith.constant 0 : index
    %1 = vector.load %arg1[%c0, %c0_0] : memref<8x8xi32, #tpu.memory_space<vmem>>, vector<8x8xi32>
    %2 = vector.shape_cast %1 : vector<8x8xi32> to vector<8x8x1xi32>
    %3 = vector.broadcast %2 : vector<8x8x1xi32> to vector<8x8x128xi32>
    %4 = arith.cmpi eq, %3, %0 : vector<8x8x128xi32>
    %5 = arith.extui %4 : vector<8x8x128xi1> to vector<8x8x128xi32>
    %6 = arith.sitofp %5 : vector<8x8x128xi32> to vector<8x8x128xf32>
    %cst = arith.constant dense<0.000000e+00> : vector<8x128xf32>
    %7 = vector.multi_reduction <add>, %6, %cst [1] : vector<8x8x128xf32> to vector<8x128xf32>
    %8 = tpu.iota {dimensions = array<i32: 1>} : vector<1x128xi32>
    %c1_i32 = arith.constant 1 : i32
    %9 = vector.broadcast %c1_i32 : i32 to vector<1x128xi32>
    %10 = arith.cmpi ne, %8, %9 : vector<1x128xi32>
    %11 = arith.extui %10 : vector<1x128xi1> to vector<1x128xi32>
    %12 = arith.sitofp %11 : vector<1x128xi32> to vector<1x128xf32>
    %13 = vector.broadcast %12 : vector<1x128xf32> to vector<8x128xf32>
    %14 = arith.mulf %7, %13 : vector<8x128xf32>
    %15 = vector.extract_strided_slice %7 {offsets = [0, 1], sizes = [8, 1], strides = [1, 1]} : vector<8x128xf32> to vector<8x1xf32>
    %cst_1 = arith.constant 8.000000e+00 : f32
    %16 = vector.broadcast %cst_1 : f32 to vector<8x1xf32>
    %17 = arith.subf %16, %15 : vector<8x1xf32>
    %cst_2 = arith.constant 1.000000e+00 : f32
    %18 = vector.broadcast %cst_2 : f32 to vector<8x1xf32>
    %19 = arith.maximumf %17, %18 : vector<8x1xf32>
    %20 = arith.truncf %14 : vector<8x128xf32> to vector<8x128xbf16>
    %c0_3 = arith.constant 0 : index
    %c0_4 = arith.constant 0 : index
    %21 = vector.load %arg2[%c0_3, %c0_4] : memref<128x32xbf16, #tpu.memory_space<vmem>>, vector<128x32xbf16>
    %cst_5 = arith.constant dense<0.000000e+00> : vector<8x32xf32>
    %22 = tpu.matmul %20, %21, %cst_5 {dimension_numbers = #tpu.dot_dimension_numbers<[1], [0], [0], [1], [0, 0, 1, 1], [], []>} : vector<8x128xbf16>, vector<128x32xbf16>, vector<8x32xf32> -> vector<8x32xf32>
    %23 = vector.broadcast %19 : vector<8x1xf32> to vector<8x32xf32>
    %24 = arith.divf %22, %23 : vector<8x32xf32>
    %c0_6 = arith.constant 0 : index
    %c0_7 = arith.constant 0 : index
    %25 = vector.load %arg3[%c0_6, %c0_7] : memref<32x128xf32, #tpu.memory_space<vmem>>, vector<32x128xf32>
    %cst_8 = arith.constant dense<0.000000e+00> : vector<8x128xf32>
    %26 = tpu.matmul %24, %25, %cst_8 {dimension_numbers = #tpu.dot_dimension_numbers<[1], [0], [0], [1], [0, 0, 1, 1], [], []>} : vector<8x32xf32>, vector<32x128xf32>, vector<8x128xf32> -> vector<8x128xf32>
    %c0_9 = arith.constant 0 : index
    %c0_10 = arith.constant 0 : index
    %27 = vector.load %arg4[%c0_9, %c0_10] : memref<1x128xf32, #tpu.memory_space<vmem>>, vector<1x128xf32>
    %28 = vector.broadcast %27 : vector<1x128xf32> to vector<8x128xf32>
    %29 = arith.addf %26, %28 : vector<8x128xf32>
    %30 = arith.negf %29 : vector<8x128xf32>
    %31 = math.exp %30 : vector<8x128xf32>
    %cst_11 = arith.constant 1.000000e+00 : f32
    %32 = vector.broadcast %cst_11 : f32 to vector<8x128xf32>
    %33 = arith.addf %32, %31 : vector<8x128xf32>
    %34 = arith.divf %32, %33 : vector<8x128xf32>
    %c0_12 = arith.constant 0 : index
    %c0_13 = arith.constant 0 : index
    %35 = vector.load %arg5[%c0_12, %c0_13] : memref<8x128xf32, #tpu.memory_space<vmem>>, vector<8x128xf32>
    tpu.vector_store %arg5[%c0_12, %c0_13], %34 {strides = array<i32>} : memref<8x128xf32, #tpu.memory_space<vmem>>, vector<8x128xf32>,
    return
  }
  func.func @transform_0(%arg0: i32) -> (i32, i32) {
    %c0_i32 = arith.constant 0 : i32
    %c0_i32_0 = arith.constant 0 : i32
    return %arg0, %c0_i32 : i32, i32
  }
  func.func @transform_1(%arg0: i32) -> (i32, i32) {
    %c0_i32 = arith.constant 0 : i32
    %c0_i32_0 = arith.constant 0 : i32
    %c0_i32_1 = arith.constant 0 : i32
    return %c0_i32, %c0_i32_0 : i32, i32
  }
  func.func @transform_2(%arg0: i32) -> (i32, i32) {
    %c0_i32 = arith.constant 0 : i32
    %c0_i32_0 = arith.constant 0 : i32
    %c0_i32_1 = arith.constant 0 : i32
    return %c0_i32, %c0_i32_0 : i32, i32
  }
  func.func @transform_3(%arg0: i32) -> (i32, i32) {
    %c0_i32 = arith.constant 0 : i32
    %c0_i32_0 = arith.constant 0 : i32
    %c0_i32_1 = arith.constant 0 : i32
    return %c0_i32, %c0_i32_0 : i32, i32
  }
  func.func @transform_4(%arg0: i32) -> (i32, i32) {
    %c0_i32 = arith.constant 0 : i32
    %c0_i32_0 = arith.constant 0 : i32
    return %arg0, %c0_i32 : i32, i32
  }
}

</mosaic_0001>

<bundles_post_ra>
// kernel: tpu_custom_call.1
= control target key start
LH: loop header
LB: loop body
LE: loop exit
PB: predicated region body
PF: predicated region fallthrough
CT: control target
= control target key end

     0   :  { %v19_v0 = vlaneseq  ;;  %v583_v1 = vmov 0.0   ;;  %s704_s0 = inlined_call_operand.vmem [shape: s32[8,8], index: 0, kind: input, shape index: {}]   ;;  %s705_s1 = inlined_call_operand.vmem [shape: bf16[128,32], index: 1, kind: input, shape index: {}]   ;;  %s706_s2 = inlined_call_operand.vmem [shape: f32[32,128], index: 2, kind: input, shape index: {}]   ;;  %s707_s3 = inlined_call_operand.vmem [shape: f32[1,128], index: 3, kind: input, shape index: {}]   ;;  %s708_s4 = inlined_call_operand.hbm [shape: f32[8,128], index: 4, kind: output, shape index: {}]  }
   0x1   :  { %510 = vmatprep.subr.bf16.mxu0 %v583_v1  ;;  %v547_v2 = vld [vmem:[%s705_s1 + $0x38] sm:$0xff]   ;;  %530 = vmatprep.subr.mxu1 %v583_v1  ;;  %v21_v3 = vld [vmem:[%s704_s0] sm:$0xff]  ;;  %v548_v11 = vld [vmem:[%s705_s1 + $0x30] sm:$0xff]  }
   0x2   :  { %v23_v4 = vshrl.u32 %v19_v0, 7  ;;  %511 = vmatpush3.bf16.msra.mxu0 %v547_v2 }
   0x3   :  { %512 = vmatprep.subr.bf16.mxu0 %v583_v1 }
   0x4   :  { %v31_v5 = vsub.s32 1, %v23_v4  ;;  %v24_v6 = vsub.s32 0, %v23_v4  ;;  %v38_v7 = vsub.s32 2, %v23_v4  ;;  %v45_v8 = vsub.s32 3, %v23_v4 }
   0x5   :  { %v52_v14 = vsub.s32 4, %v23_v4  ;;  %v59_v15 = vsub.s32 5, %v23_v4 }
   0x6   :  { %v32_v9 = vrot.slane %v21_v3, %v31_v5  ;;  %v25_v10 = vrot.slane %v21_v3, %v24_v6  ;;  %v39_v12 = vrot.slane %v21_v3, %v38_v7  ;;  %v46_v13 = vrot.slane %v21_v3, %v45_v8 }
   0x8   :  { %34 = vbcast.lane.b32.xlu0 %v32_v9, 256  ;;  %27 = vbcast.lane.b32.xlu1 %v25_v10, 256 }
   0x9   :  { %9 = vsyncpa [#allocation3], 0  ;;  %513 = vmatpush3.bf16.msra.mxu0 %v548_v11  ;;  %v549_v16 = vld [vmem:[%s705_s1 + $0x28] sm:$0xff]   ;;  %v53_v17 = vrot.slane %v21_v3, %v52_v14  ;;  %v60_v18 = vrot.slane %v21_v3, %v59_v15  ;;  %v66_v19 = vsub.s32 6, %v23_v4  ;;  %v73_v20 = vsub.s32 7, %v23_v4  ;;  %v550_v22 = vld [vmem:[%s705_s1 + $0x20] sm:$0xff]  }
   0xa   :  { %514 = vmatprep.subr.bf16.mxu0 %v583_v1  ;;  %v584_v21 = vmov 1   ;;  %v551_v25 = vld [vmem:[%s705_s1 + $0x18] sm:$0xff]   ;;  %v552_v26 = vld [vmem:[%s705_s1 + $0x10] sm:$0xff]   ;;  %v553_v27 = vld [vmem:[%s705_s1 + $0x8] sm:$0xff]   ;;  %vm585_vm0 = vmmov 0   ;;  %v20_v29 = vand.u32 127, %v19_v0 }
   0xb   :  { %546 = vset.pattern.permute.xlu1 %v584_v21  ;;  %545 = vset.pattern.permute.xlu0 %v584_v21  ;;  %v67_v23 = vrot.slane %v21_v3, %v66_v19  ;;  %v74_v24 = vrot.slane %v21_v3, %v73_v20  ;;  %v554_v28 = vld [vmem:[%s705_s1] sm:$0xff]   ;;  %vm218_vm8 = vcmask 1041409   ;;  %vm221_vm11 = vcmask 1042434   ;;  %s586_s14 = smov [#allocation2]  }
   0xc   :  { %41 = vbcast.lane.b32.xlu0 %v39_v12, 256  ;;  %48 = vbcast.lane.b32.xlu1 %v46_v13, 256  ;;  %vm150_vm5 = vcmp.ne.s32.totalorder %v20_v29, 1  ;;  %vm224_vm12 = vcmask 1043459   ;;  %vm227_vm13 = vcmask 1044484   ;;  %vm230_vm14 = vcmask 1045509  }
   0xd   :  { %515 = vmatpush3.bf16.msra.mxu0 %v549_v16  ;;  %526 = vmatprep.mubr.msk.bf16.mxu0 %vm585_vm0, %v583_v1  ;;  %v657_v60 = vsel %vm150_vm5, 1.0, %v583_v1  ;;  %vm233_vm15 = vcmask 1046534   ;;  %s468_s15 = sshll.u32 %s586_s14, 4  ;;  %s469_s15 = int_to_ptr.vmem [resolvable:$true] %s468_s15 }
   0xe   :  { %516 = vmatprep.subr.bf16.mxu0 %v583_v1  ;;  %538 = vmatprep.mubr.msk.f32.mxu1 %vm585_vm0, %v583_v1  ;;  %vm236_vm0 = vcmask 1047559   ;;  %s561_s16 = scalar_lea.vmem %s469_s15, 128  ;;  %p566_p1 = scmp.lt.s32.totalorder %s469_s15, %s469_s15 }
   0xf   :  { %p562_p0 = scmp.ne.s32.totalorder %s469_s15, %s561_s16  ;;  %p567_p2 = scmp.lt.s32.totalorder %s561_s16, %s561_s16 }
  0x10   :  { %55 = vbcast.lane.b32.xlu0 %v53_v17, 256  ;;  %62 = vbcast.lane.b32.xlu1 %v60_v18, 256 }
  0x11   :  { %517 = vmatpush3.bf16.msra.mxu0 %v550_v22  ;;  %p568_p3 = por %p567_p2, %p566_p1 }
  0x12   :  { %518 = vmatprep.subr.bf16.mxu0 %v583_v1 }
  0x13   :  { %p569_p4 = pnand %p568_p3, %p562_p0 }
  0x14   :  { %69 = vbcast.lane.b32.xlu0 %v67_v23, 256  ;;  %76 = vbcast.lane.b32.xlu1 %v74_v24, 256 }
  0x15   :  { %519 = vmatpush3.bf16.msra.mxu0 %v551_v25 }
  0x16   :  { %520 = vmatprep.subr.bf16.mxu0 %v583_v1 }
  0x19   :  { %521 = vmatpush3.bf16.msra.mxu0 %v552_v26 }
  0x1a   :  { %522 = vmatprep.subr.bf16.mxu0 %v583_v1 }
  0x1d   :  { %523 = vmatpush3.bf16.msra.mxu0 %v553_v27 }
  0x1e   :  { %524 = vmatprep.subr.bf16.mxu0 %v583_v1 }
  0x21   :  { %525 = vmatpush3.bf16.msra.mxu0 %v554_v28 }
  0x7a   :  { %v35_v30 = vpop.permute.xlu0 %34  ;;  %v28_v31 = vpop.permute.xlu1 %27 }
  0x7b   :  { %vm79_vm1 = vcmp.eq.s32.totalorder %v35_v30, %v20_v29  ;;  %vm78_vm2 = vcmp.eq.s32.totalorder %v28_v31, %v20_v29 }
  0x7c   :  { %v477_v32 = vsel %vm79_vm1, 1.0, %v583_v1  ;;  %v476_v33 = vsel %vm78_vm2, 1.0, %v583_v1  ;;  %vm381_vm1 = vcmask 261120  }
  0x7d   :  { %v108_v34 = vrot.slane %v477_v32, 4  ;;  %v102_v35 = vrot.slane %v476_v33, 4 }
  0x7e   :  { %v42_v36 = vpop.permute.xlu0 %41  ;;  %v49_v37 = vpop.permute.xlu1 %48 }
  0x7f   :  { %v109_v38 = vadd.f32 %v477_v32, %v108_v34  ;;  %v103_v39 = vadd.f32 %v476_v33, %v102_v35  ;;  %vm80_vm3 = vcmp.eq.s32.totalorder %v42_v36, %v20_v29  ;;  %vm81_vm4 = vcmp.eq.s32.totalorder %v49_v37, %v20_v29 }
  0x80   :  { %v478_v40 = vsel %vm80_vm3, 1.0, %v583_v1  ;;  %v479_v41 = vsel %vm81_vm4, 1.0, %v583_v1 }
  0x81   :  { %v110_v42 = vrot.slane %v109_v38, 2  ;;  %v104_v43 = vrot.slane %v103_v39, 2  ;;  %v114_v44 = vrot.slane %v478_v40, 4  ;;  %v120_v45 = vrot.slane %v479_v41, 4 }
  0x82   :  { %v56_v46 = vpop.permute.xlu0 %55  ;;  %v63_v47 = vpop.permute.xlu1 %62 }
  0x83   :  { %v111_v48 = vadd.f32 %v110_v42, %v109_v38  ;;  %v105_v49 = vadd.f32 %v104_v43, %v103_v39  ;;  %v115_v50 = vadd.f32 %v478_v40, %v114_v44  ;;  %v121_v51 = vadd.f32 %v479_v41, %v120_v45 }
  0x84   :  { %vm82_vm6 = vcmp.eq.s32.totalorder %v56_v46, %v20_v29  ;;  %vm83_vm7 = vcmp.eq.s32.totalorder %v63_v47, %v20_v29 }
  0x85   :  { %v112_v52 = vrot.slane %v111_v48, 1  ;;  %v106_v53 = vrot.slane %v105_v49, 1  ;;  %v116_v54 = vrot.slane %v115_v50, 2  ;;  %v122_v55 = vrot.slane %v121_v51, 2 }
  0x86   :  { %v480_v56 = vsel %vm82_vm6, 1.0, %v583_v1  ;;  %v481_v57 = vsel %vm83_vm7, 1.0, %v583_v1  ;;  %v70_v58 = vpop.permute.xlu0 %69  ;;  %v77_v59 = vpop.permute.xlu1 %76 }
  0x87   :  { %v117_v61 = vadd.f32 %v116_v54, %v115_v50  ;;  %v123_v62 = vadd.f32 %v122_v55, %v121_v51  ;;  %v126_v63 = vrot.slane %v480_v56, 4  ;;  %v132_v0 = vrot.slane %v481_v57, 4 }
  0x88   :  { %vm84_vm9 = vcmp.eq.s32.totalorder %v70_v58, %v20_v29  ;;  %vm85_vm10 = vcmp.eq.s32.totalorder %v77_v59, %v20_v29  ;;  %v113_v2 = vadd.f32 %v112_v52, %v111_v48  ;;  %v107_v3 = vadd.f32 %v106_v53, %v105_v49 }
  0x89   :  { %v118_v4 = vrot.slane %v117_v61, 1  ;;  %v124_v5 = vrot.slane %v123_v62, 1  ;;  %v127_v6 = vadd.f32 %v480_v56, %v126_v63  ;;  %v133_v7 = vadd.f32 %v481_v57, %v132_v0 }
  0x8a   :  { %v482_v8 = vsel %vm84_vm9, 1.0, %v583_v1  ;;  %v483_v9 = vsel %vm85_vm10, 1.0, %v583_v1  ;;  %v162_v10 = vsub.f32 8.0, %v113_v2  ;;  %v154_v11 = vmul.f32 %v657_v60, %v113_v2 }
  0x8b   :  { %v128_v12 = vrot.slane %v127_v6, 2  ;;  %v134_v13 = vrot.slane %v133_v7, 2  ;;  %v138_v14 = vrot.slane %v482_v8, 4  ;;  %v144_v15 = vrot.slane %v483_v9, 4 }
  0x8c   :  { %v170_v16 = vmax.f32 %v162_v10, 1.0  ;;  %v178_v17 = vpack.c.bf16 %v154_v11, %v154_v11  ;;  %v161_v18 = vsub.f32 8.0, %v107_v3  ;;  %v153_v19 = vmul.f32 %v657_v60, %v107_v3 }
  0x8d   :  { %v129_v20 = vadd.f32 %v128_v12, %v127_v6  ;;  %v135_v21 = vadd.f32 %v134_v13, %v133_v7  ;;  %v139_v22 = vadd.f32 %v482_v8, %v138_v14  ;;  %v145_v23 = vadd.f32 %v483_v9, %v144_v15 }
  0x8e   :  { %334 = vperm.xlu1 %546, %v170_v16   ;;  %v210_v24 = vunpack.c.l.b16 %v178_v17  ;;  %v169_v25 = vmax.f32 %v161_v18, 1.0  ;;  %v177_v26 = vpack.c.bf16 %v153_v19, %v153_v19  ;;  %v119_v27 = vadd.f32 %v118_v4, %v117_v61  ;;  %v373_v18 = vld [vmem:[%s706_s2 + $0x18] sm:$0xff] }
  0x8f   :  { %v130_v28 = vrot.slane %v129_v20, 1  ;;  %v136_v29 = vrot.slane %v135_v21, 1  ;;  %v140_v30 = vrot.slane %v139_v22, 2  ;;  %v146_v31 = vrot.slane %v145_v23, 2  ;;  %531 = vmatpush3.msra.mxu1 %v373_v18 }
  0x90   :  { %v217_v32 = vrot.slane %v210_v24, 7  ;;  %330 = vperm.xlu0 %545, %v169_v25   ;;  %v209_v33 = vunpack.c.l.b16 %v177_v26  ;;  %v155_v34 = vmul.f32 %v657_v60, %v119_v27  ;;  %v163_v35 = vsub.f32 8.0, %v119_v27  ;;  %532 = vmatprep.subr.mxu1 %v583_v1  ;;  %v371_v26 = vld [vmem:[%s706_s2 + $0x8] sm:$0xff]  ;;  %v370_v27 = vld [vmem:[%s706_s2] sm:$0xff] }
  0x91   :  { %v141_v36 = vadd.f32 %v140_v30, %v139_v22  ;;  %v147_v37 = vadd.f32 %v146_v31, %v145_v23  ;;  %v125_v38 = vadd.f32 %v124_v5, %v123_v62  ;;  %v131_v39 = vadd.f32 %v130_v28, %v129_v20 }
  0x92   :  { %v219_v40 = vsel %vm218_vm8, %v217_v32, %v209_v33  ;;  %v171_v41 = vmax.f32 %v163_v35, 1.0  ;;  %v179_v42 = vpack.c.bf16 %v155_v34, %v155_v34  ;;  %v137_v43 = vadd.f32 %v136_v29, %v135_v21 }
  0x93   :  { %v142_v44 = vrot.slane %v141_v36, 1  ;;  %v148_v45 = vrot.slane %v147_v37, 1  ;;  %v156_v46 = vmul.f32 %v657_v60, %v125_v38  ;;  %v164_v47 = vsub.f32 8.0, %v125_v38 }
  0x94   :  { %v211_v48 = vunpack.c.l.b16 %v179_v42  ;;  %338 = vperm.xlu1 %546, %v171_v41   ;;  %v157_v49 = vmul.f32 %v657_v60, %v131_v39  ;;  %v165_v50 = vsub.f32 8.0, %v131_v39  ;;  %v158_v51 = vmul.f32 %v657_v60, %v137_v43 }
  0x95   :  { %v172_v52 = vmax.f32 %v164_v47, 1.0  ;;  %v180_v53 = vpack.c.bf16 %v156_v46, %v156_v46  ;;  %v166_v54 = vsub.f32 8.0, %v137_v43  ;;  %v143_v55 = vadd.f32 %v142_v44, %v141_v36 }
  0x96   :  { %v220_v56 = vrot.slane %v211_v48, 6  ;;  %v173_v57 = vmax.f32 %v165_v50, 1.0  ;;  %v181_v58 = vpack.c.bf16 %v157_v49, %v157_v49  ;;  %v182_v59 = vpack.c.bf16 %v158_v51, %v158_v51  ;;  %v493_v48 = vld [vmem:[%s707_s3] ss:$0 sm:$0xff] }
  0x97   :  { %v212_v61 = vunpack.c.l.b16 %v180_v53  ;;  %342 = vperm.xlu0 %545, %v172_v52   ;;  %v174_v62 = vmax.f32 %v166_v54, 1.0  ;;  %v159_v63 = vmul.f32 %v657_v60, %v143_v55  ;;  %v167_v0 = vsub.f32 8.0, %v143_v55 }
  0x98   :  { %v222_v2 = vsel %vm221_vm11, %v220_v56, %v219_v40  ;;  %v213_v3 = vunpack.c.l.b16 %v181_v58  ;;  %346 = vperm.xlu1 %546, %v173_v57   ;;  %v214_v4 = vunpack.c.l.b16 %v182_v59  ;;  %v149_v5 = vadd.f32 %v148_v45, %v147_v37 }
  0x99   :  { %v223_v6 = vrot.slane %v212_v61, 5  ;;  %v175_v7 = vmax.f32 %v167_v0, 1.0  ;;  %v183_v8 = vpack.c.bf16 %v159_v63, %v159_v63 }
  0x9a   :  { %v226_v9 = vrot.slane %v213_v3, 4  ;;  %v229_v10 = vrot.slane %v214_v4, 3  ;;  %v160_v11 = vmul.f32 %v657_v60, %v149_v5  ;;  %v168_v12 = vsub.f32 8.0, %v149_v5  ;;  %v372_v60 = vld [vmem:[%s706_s2 + $0x10] sm:$0xff] }
  0x9b   :  { %350 = vperm.xlu0 %545, %v174_v62   ;;  %v215_v13 = vunpack.c.l.b16 %v183_v8  ;;  %v225_v14 = vsel %vm224_vm12, %v223_v6, %v222_v2  ;;  %533 = vmatpush3.msra.mxu1 %v372_v60 }
  0x9c   :  { %354 = vperm.xlu1 %546, %v175_v7   ;;  %v176_v15 = vmax.f32 %v168_v12, 1.0  ;;  %v184_v16 = vpack.c.bf16 %v160_v11, %v160_v11  ;;  %v228_v17 = vsel %vm227_vm13, %v226_v9, %v225_v14  ;;  %534 = vmatprep.subr.mxu1 %v583_v1 }
  0x9d   :  { %v232_v19 = vrot.slane %v215_v13, 2  ;;  %v231_v21 = vsel %vm230_vm14, %v229_v10, %v228_v17  ;;  %535 = vmatpush3.msra.mxu1 %v371_v26 }
  0x9e   :  { %v216_v20 = vunpack.c.l.b16 %v184_v16  ;;  %536 = vmatprep.subr.mxu1 %v583_v1 }
  0x9f   :  { %358 = vperm.xlu0 %545, %v176_v15   ;;  %v234_v22 = vsel %vm233_vm15, %v232_v19, %v231_v21  ;;  %537 = vmatpush3.msra.mxu1 %v370_v27 }
  0xa0   :  { %v235_v23 = vrot.slane %v216_v20, 1 }
  0xa2   :  { %v237_v24 = vsel %vm236_vm0, %v235_v23, %v234_v22 }
  0xa3   :  { %v238_v25 = vpack.c.b16 %v237_v24, %v237_v24 }
  0xa5   :  { %527 = vmatmul.mubr.bf16.vlgmr.msra.gmra.mxu0 %v238_v25 }
 0x109   :  { %v335_v28 = vpop.permute.xlu1 %334 }
 0x10b   :  { %v331_v29 = vpop.permute.xlu0 %330 }
 0x10c   :  { %v360_v32 = vsel %vm218_vm8, %v335_v28, %v331_v29 }
 0x10f   :  { %v339_v30 = vpop.permute.xlu1 %338 }
 0x110   :  { %v361_v34 = vsel %vm221_vm11, %v339_v30, %v360_v32 }
 0x112   :  { %v343_v31 = vpop.permute.xlu0 %342 }
 0x113   :  { %v347_v33 = vpop.permute.xlu1 %346  ;;  %v362_v36 = vsel %vm224_vm12, %v343_v31, %v361_v34 }
 0x114   :  { %v363_v37 = vsel %vm227_vm13, %v347_v33, %v362_v36 }
 0x116   :  { %v351_v35 = vpop.permute.xlu0 %350 }
 0x117   :  { %v355_v38 = vpop.permute.xlu1 %354  ;;  %v364_v39 = vsel %vm230_vm14, %v351_v35, %v363_v37 }
 0x118   :  { %v365_v1 = vsel %vm233_vm15, %v355_v38, %v364_v39 }
 0x11a   :  { %v359_v40 = vpop.permute.xlu0 %358 }
 0x11b   :  { %v366_v41 = vsel %vm236_vm0, %v359_v40, %v365_v1 }
 0x11c   :  { %555 = vrcp.f32 %v366_v41 }
 0x129   :  { %v556_v42 = vpop.eup %555 }
 0x165   :  { %v322_v43 = vpop.f32.mrf.mxu0 }
 0x166   :  { %v369_v44 = vmul.f32 %v556_v42, %v322_v43 }
 0x167   :  { %v528_v45 = vpop.f32.mrf.mxu0 }
 0x168   :  { %539 = vmatmul.mubr.msk.f32.vlgmr.msra.gmra.mxu1 %vm381_vm1, %v369_v44 }
 0x169   :  { %v325_v46 = vpop.f32.mrf.mxu0 }
 0x16b   :  { %v529_v47 = vpop.f32.mrf.mxu0 }
 0x228   :  { %v451_v49 = vpop.f32.mrf.mxu1 }
 0x229   :  { %v452_v50 = vadd.f32 %v493_v48, %v451_v49 }
 0x22a   :  { %v540_v51 = vpop.f32.mrf.mxu1 }
 0x22b   :  { %v495_v52 = vmul.f32 -1.442695, %v452_v50 }
 0x22d   :  { %557 = vpow2.f32 %v495_v52 }
 0x23a   :  { %v558_v53 = vpop.eup %557 }
 0x23b   :  { %v458_v54 = vadd.f32 1.0, %v558_v53 }
 0x23d   :  { %559 = vrcp.f32 %v458_v54 }
 0x24a   :  { %v560_v55 = vpop.eup %559 }
 0x24b   :  { %461 = vst [vmem:[#allocation2] sm:$0xff] %v560_v55 }
 0x24c   :  { %572 = shalt.err (!%p569_p4)
}
 0x24d   :  { %471 = dma.vmem_to_hbm [thread:$0]  %s469_s15, 128, %s708_s4, [#allocation3]  }
 0x24e   :  { %581 = dma.done.wait [#allocation3], 128  }
 0x24f   :  { %582 = vsyncadd [#allocation3], 4294967168 }
 0x250   :  { %475 = vsyncpa [#allocation3], 1 }

</bundles_post_ra>
